<compile_context>
chip_gen: v7x
topology: tpu7x:2x2x1
jax: 0.10.0
libtpu: 0.0.40
codegen_flags: <defaults>
</compile_context>

<pallas_src>
import jax
import jax.numpy as jnp
from jax.experimental import pallas as pl
from jax.experimental.pallas import tpu as pltpu


def _head_kernel(x_ref, w1t_ref, shift_ref, w2t_ref, o_ref):
    # x_ref:     (1, C_in,  TP)   pixel tile of one image, channels on sublanes
    # w1t_ref:   (C_proj, C_in)   conv1 weight^T with the folded BN scale baked in
    # shift_ref: (C_proj, 1)      folded BN shift = beta - mean * scale
    # w2t_ref:   (C_out,  C_proj) conv2 weight^T, C_out = 2 * out_channels
    # o_ref:     (1, C_out, TP)
    x = x_ref[0]                                                   # (C_in, TP)
    h = jnp.dot(w1t_ref[...], x, preferred_element_type=jnp.float32)
    h = jnp.maximum(h + shift_ref[...], 0.0)                       # (C_proj, TP)
    o_ref[0] = jnp.dot(w2t_ref[...], h,
                       preferred_element_type=jnp.float32).astype(o_ref.dtype)


def _pick_pixel_tile(P, max_tile=512):
    if P <= max_tile:
        return P                      # full-dim block: exempt from the 128-lane rule
    return max((max_tile // 128) * 128, 128)


def binary_head_forward(x, w1, bn_scale, bn_shift, w2, *, max_pixel_tile=512):
    """x: (N, C_in, H, W) NCHW -> (N, 2, out_channels, H, W)."""
    N, c_in, H, W = x.shape
    c_proj = w1.shape[1]
    c_out = w2.shape[1]
    P = H * W

    # Fold the BN scale into conv1's columns; transpose weights to (out, in)
    # so the kernel's matmuls keep pixels on the lane (last) dimension.
    w1t = (w1 * bn_scale[None, :]).T          # (C_proj, C_in)
    w2t = w2.T                                # (C_out,  C_proj)
    shift2d = bn_shift.reshape(c_proj, 1)

    x3 = x.reshape(N, c_in, P)                # pure reshape of NCHW, no copy

    tp = _pick_pixel_tile(P, max_pixel_tile)
    grid = (N, pl.cdiv(P, tp))

    out = pl.pallas_call(
        _head_kernel,
        out_shape=jax.ShapeDtypeStruct((N, c_out, P), x.dtype),
        grid_spec=pltpu.PrefetchScalarGridSpec(
            num_scalar_prefetch=0,
            grid=grid,
            in_specs=[
                pl.BlockSpec((1, c_in, tp), lambda n, j: (n, 0, j)),
                pl.BlockSpec((c_proj, c_in), lambda n, j: (0, 0)),
                pl.BlockSpec((c_proj, 1), lambda n, j: (0, 0)),
                pl.BlockSpec((c_out, c_proj), lambda n, j: (0, 0)),
            ],
            out_specs=pl.BlockSpec((1, c_out, tp), lambda n, j: (n, 0, j)),
        ),
        compiler_params=pltpu.CompilerParams(
            dimension_semantics=("parallel", "parallel")),
    )(x3, w1t, shift2d, w2t)

    return out.reshape(N, 2, c_out // 2, H, W)


class BinaryHeadBlockPallas:
    """JAX/Pallas port of BinaryHeadBlock (eval-mode BatchNorm)."""

    def __init__(self, in_channels, proj_channels, out_channels, *, key, eps=1e-5):
        k1, k2, k3, k4, k5, k6 = jax.random.split(key, 6)
        # Conv1 weight: PyTorch shape (proj, in, 1, 1) -> matmul form (in, proj).
        self.w1 = jax.random.normal(k1, (in_channels, proj_channels),
                                    jnp.float32) * 0.1
        # BatchNorm2d parameters / running stats (deterministic, non-trivial).
        self.gamma = 1.0 + 0.1 * jax.random.normal(k2, (proj_channels,), jnp.float32)
        self.beta = 0.1 * jax.random.normal(k3, (proj_channels,), jnp.float32)
        self.running_mean = 0.1 * jax.random.normal(k4, (proj_channels,), jnp.float32)
        self.running_var = jnp.abs(
            1.0 + 0.1 * jax.random.normal(k5, (proj_channels,), jnp.float32))
        self.eps = eps
        # Conv2 weight: (out*2, proj, 1, 1) -> (proj, out*2).
        self.w2 = jax.random.normal(k6, (proj_channels, out_channels * 2),
                                    jnp.float32) * 0.1
        self.out_channels = out_channels

    def _folded_bn(self):
        scale = self.gamma / jnp.sqrt(self.running_var + self.eps)
        shift = self.beta - self.running_mean * scale
        return scale, shift

    def __call__(self, x):
        # x: NCHW, matching the PyTorch module.
        scale, shift = self._folded_bn()
        return binary_head_forward(x, self.w1, scale, shift, self.w2)

    def reference(self, x):
        """Pure-JAX reference (no Pallas) for validation."""
        N, C, H, W = x.shape
        scale, shift = self._folded_bn()
        h = jnp.einsum('nchw,cp->nphw', x, self.w1)
        h = jnp.maximum(h * scale[None, :, None, None]
                        + shift[None, :, None, None], 0.0)
        y = jnp.einsum('nphw,po->nohw', h, self.w2)
        return y.reshape(N, 2, self.out_channels, H, W)


if __name__ == "__main__":
    key = jax.random.PRNGKey(0)
    k_param, k_input = jax.random.split(key)

    in_channels, proj_channels, out_channels = 4, 32, 4
    N, H, W = 2, 16, 16

    block = BinaryHeadBlockPallas(in_channels, proj_channels, out_channels,
                                  key=k_param)
    x = jax.random.normal(k_input, (N, in_channels, H, W), jnp.float32)

    y = jax.block_until_ready(block(x))

    y_ref = block.reference(x)
    assert y.shape == (N, 2, out_channels, H, W), y.shape
    assert jnp.allclose(y, y_ref, atol=1e-4, rtol=1e-4), \
        float(jnp.max(jnp.abs(y - y_ref)))

    print("KERNEL_OK")
</pallas_src>

<mosaic_0001>
module attributes {stable_mosaic.version = 11 : i64} {
  func.func @_head_kernel(%arg0: i32, %arg1: i32, %arg2: memref<1x4x256xf32, #tpu.memory_space<vmem>>, %arg3: memref<32x4xf32, #tpu.memory_space<vmem>>, %arg4: memref<32x1xf32, #tpu.memory_space<vmem>>, %arg5: memref<8x32xf32, #tpu.memory_space<vmem>>, %arg6: memref<1x8x256xf32, #tpu.memory_space<vmem>>) attributes {dimension_semantics = [#tpu.dimension_semantics<parallel>, #tpu.dimension_semantics<parallel>], iteration_bounds = array<i64: 2, 1>, scalar_prefetch = 0 : i64, scratch_operands = 0 : i64, tpu.core_type = #tpu.core_type<tc>, window_params = [{transform_indices = @transform_0, window_bounds = array<i64: 1, 4, 256>}, {pipeline_mode = #tpu.pipeline_mode<synchronous>, transform_indices = @transform_1, window_bounds = array<i64: 32, 4>}, {pipeline_mode = #tpu.pipeline_mode<synchronous>, transform_indices = @transform_2, window_bounds = array<i64: 32, 1>}, {pipeline_mode = #tpu.pipeline_mode<synchronous>, transform_indices = @transform_3, window_bounds = array<i64: 8, 32>}, {transform_indices = @transform_4, window_bounds = array<i64: 1, 8, 256>}]} {
    %c0 = arith.constant 0 : index
    %c0_0 = arith.constant 0 : index
    %c0_1 = arith.constant 0 : index
    %0 = vector.load %arg2[%c0, %c0_0, %c0_1] : memref<1x4x256xf32, #tpu.memory_space<vmem>>, vector<1x4x256xf32>
    %1 = vector.shape_cast %0 : vector<1x4x256xf32> to vector<4x256xf32>
    %c0_2 = arith.constant 0 : index
    %c0_3 = arith.constant 0 : index
    %2 = vector.load %arg3[%c0_2, %c0_3] : memref<32x4xf32, #tpu.memory_space<vmem>>, vector<32x4xf32>
    %cst = arith.constant dense<0.000000e+00> : vector<32x256xf32>
    %3 = tpu.matmul %2, %1, %cst {dimension_numbers = #tpu.dot_dimension_numbers<[1], [0], [0], [1], [0, 0, 1, 1], [], []>} : vector<32x4xf32>, vector<4x256xf32>, vector<32x256xf32> -> vector<32x256xf32>
    %c0_4 = arith.constant 0 : index
    %c0_5 = arith.constant 0 : index
    %4 = vector.load %arg4[%c0_4, %c0_5] : memref<32x1xf32, #tpu.memory_space<vmem>>, vector<32x1xf32>
    %5 = vector.broadcast %4 : vector<32x1xf32> to vector<32x256xf32>
    %6 = arith.addf %3, %5 : vector<32x256xf32>
    %cst_6 = arith.constant 0.000000e+00 : f32
    %7 = vector.broadcast %cst_6 : f32 to vector<32x256xf32>
    %8 = arith.maximumf %6, %7 : vector<32x256xf32>
    %c0_7 = arith.constant 0 : index
    %c0_8 = arith.constant 0 : index
    %9 = vector.load %arg5[%c0_7, %c0_8] : memref<8x32xf32, #tpu.memory_space<vmem>>, vector<8x32xf32>
    %cst_9 = arith.constant dense<0.000000e+00> : vector<8x256xf32>
    %10 = tpu.matmul %9, %8, %cst_9 {dimension_numbers = #tpu.dot_dimension_numbers<[1], [0], [0], [1], [0, 0, 1, 1], [], []>} : vector<8x32xf32>, vector<32x256xf32>, vector<8x256xf32> -> vector<8x256xf32>
    %c0_10 = arith.constant 0 : index
    %c0_11 = arith.constant 0 : index
    %c0_12 = arith.constant 0 : index
    %11 = vector.load %arg6[%c0_10, %c0_11, %c0_12] : memref<1x8x256xf32, #tpu.memory_space<vmem>>, vector<1x8x256xf32>
    %12 = vector.shape_cast %11 : vector<1x8x256xf32> to vector<8x256xf32>
    %13 = vector.shape_cast %10 : vector<8x256xf32> to vector<1x8x256xf32>
    tpu.vector_store %arg6[%c0_10, %c0_11, %c0_12], %13 {strides = array<i32>} : memref<1x8x256xf32, #tpu.memory_space<vmem>>, vector<1x8x256xf32>,
    return
  }
  func.func @transform_0(%arg0: i32, %arg1: i32) -> (i32, i32, i32) {
    %c0_i32 = arith.constant 0 : i32
    %c0_i32_0 = arith.constant 0 : i32
    return %arg0, %c0_i32, %arg1 : i32, i32, i32
  }
  func.func @transform_1(%arg0: i32, %arg1: i32) -> (i32, i32) {
    %c0_i32 = arith.constant 0 : i32
    %c0_i32_0 = arith.constant 0 : i32
    %c0_i32_1 = arith.constant 0 : i32
    return %c0_i32, %c0_i32_0 : i32, i32
  }
  func.func @transform_2(%arg0: i32, %arg1: i32) -> (i32, i32) {
    %c0_i32 = arith.constant 0 : i32
    %c0_i32_0 = arith.constant 0 : i32
    %c0_i32_1 = arith.constant 0 : i32
    return %c0_i32, %c0_i32_0 : i32, i32
  }
  func.func @transform_3(%arg0: i32, %arg1: i32) -> (i32, i32) {
    %c0_i32 = arith.constant 0 : i32
    %c0_i32_0 = arith.constant 0 : i32
    %c0_i32_1 = arith.constant 0 : i32
    return %c0_i32, %c0_i32_0 : i32, i32
  }
  func.func @transform_4(%arg0: i32, %arg1: i32) -> (i32, i32, i32) {
    %c0_i32 = arith.constant 0 : i32
    %c0_i32_0 = arith.constant 0 : i32
    return %arg0, %c0_i32, %arg1 : i32, i32, i32
  }
}

</mosaic_0001>

<bundles_post_ra>
// kernel: tpu_custom_call.1
= control target key start
LH: loop header
LB: loop body
LE: loop exit
PB: predicated region body
PF: predicated region fallthrough
CT: control target
= control target key end

     0   :  { %9 = vsyncpa [#allocation3], 0  ;;  %s881_s0 = inlined_call_operand.vmem [shape: f32[2,4,256], index: 0, kind: input, shape index: {}]   ;;  %s882_s1 = inlined_call_operand.vmem [shape: f32[32,4], index: 1, kind: input, shape index: {}]   ;;  %s883_s2 = inlined_call_operand.vmem [shape: f32[32,1], index: 2, kind: input, shape index: {}]   ;;  %s884_s3 = inlined_call_operand.vmem [shape: f32[8,32], index: 3, kind: input, shape index: {}]   ;;  %s885_s4 = inlined_call_operand.hbm [shape: f32[2,8,256], index: 4, kind: output, shape index: {}]  }
   0x1   :  { %11 = vsyncpa [#allocation3 + $0x1], 0  ;;  %s742_s15 = smov 0   ;;  %s744_s16 = smov 0  }
   0x2   :  { %s746_s17 = smov 0   ;;  %s748_s18 = smov 0  }
   0x3   :  { %s750_s19 = smov 0   ;;  %s752_s20 = smov 0  }
   0x4 LB: > { %s544_s21 = sadd.s32 4294967295, %s712_s20   ;;  %s545_s22 = sadd.s32 4294967294, %s712_s20   ;;  %s712_s20 = sphi %s752_s20, %s17_s20   ;;  %s708_s19 = sphi %s750_s19, %s892_s19   ;;  %s704_s18 = sphi %s748_s18, %s891_s18   ;;  %s700_s17 = sphi %s746_s17, %s890_s17   ;;  %s696_s16 = sphi %s744_s16, %s889_s16   ;;  %s692_s15 = sphi %s742_s15, %s888_s15  }
   0x5   : > { %s29_s23 = sadd.s32 1, %s708_s19  ;;  %s129_s24 = sadd.s32 1, %s700_s17 }
   0x6   : > { %p31_p0 = scmp.ge.s32.totalorder %s29_s23, 2  ;;  %p139_p1 = scmp.ne.s32.totalorder %s700_s17, %s696_s16 }
   0x7   : > { %p140_p2 = scmp.eq.s32.totalorder %s544_s21, 1  ;;  %p145_p3 = scmp.ne.s32.totalorder %s696_s16, %s692_s15 }
   0x8   : > { %s894_s23 = smov (%p31_p0, %s29_s23), 0  ;;  %p146_p5 = scmp.eq.s32.totalorder %s545_s22, 1 }
   0x9   : > { %p782_p4 = por %p140_p2, %p139_p1  ;;  %s124_s26 = ssub.s32 %s708_s19, %s894_s23 }
   0xa   : > { %p548_p6 = scmp.ge.s32.totalorder %s712_s20, 1  ;;  %p127_p7 = scmp.eq.s32.totalorder %s124_s26, 0 }
   0xb   : > { %p789_p8 = por %p146_p5, %p145_p3  ;;  %p186_p9 = scmp.lt.s32.totalorder %s712_s20, 3 }
   0xc   : > { %s795_s28 = scalar_select %p127_p7, %s700_s17, %s129_s24  }
   0xd   : > { %p187_p10 = pnand %p548_p6, %p186_p9 }
   0xe   : > { %p217_p11 = scmp.lt.s32.totalorder (!%p187_p10), %s704_s18, 1  ;;  %v714_v0 = vmov (!%p187_p10), 0.0   ;;  %v232_v1 = vld [vmem:[%s883_s2] sm:$0xff] (!%p187_p10)  ;;  %v715_v2 = vmov (!%p187_p10), 0   ;;  %v234_v3 = vld [vmem:[%s883_s2 + $0x10] sm:$0xff] (!%p187_p10)  ;;  %v233_v4 = vld [vmem:[%s883_s2 + $0x8] sm:$0xff] (!%p187_p10) }
   0xf   : > { %190 = sbr.rel (%p187_p10) target bundleno = 493 (0x1ed), region = 36  ;;  %340 = vmatprep.mubr.f32.mxu0 (!%p187_p10), %v714_v0  ;;  %442 = vmatprep.mubr.f32.mxu1 (!%p187_p10), %v714_v0  ;;  %v235_v5 = vld [vmem:[%s883_s2 + $0x18] sm:$0xff] (!%p187_p10)  ;;  %vm271_vm0 = vcmask (!%p187_p10), 1043456   ;;  %v228_v8 = vld [vmem:[%s882_s1] sm:$0xff] (!%p187_p10)  ;;  %vm258_vm1 = vcmask (!%p187_p10), 31744   ;;  %v229_v9 = vld [vmem:[%s882_s1 + $0x8] sm:$0xff] (!%p187_p10) }
  0x10   : > { %631 = vset.pattern.permute.xlu0 (!%p187_p10), %v715_v2  ;;  %632 = vset.pattern.permute.xlu1 (!%p187_p10), %v715_v2  ;;  %v230_v10 = vld [vmem:[%s882_s1 + $0x10] sm:$0xff] (!%p187_p10)  ;;  %v231_v11 = vld [vmem:[%s882_s1 + $0x18] sm:$0xff] (!%p187_p10)  ;;  %v373_v44 = vld [vmem:[%s884_s3] sm:$0xff] (!%p187_p10)  ;;  %vm374_vm2 = vcmask (!%p187_p10), 261120   ;;  %s213_s10 = sand.u32 (!%p187_p10), 1, %s696_s16   ;;  %s565_s14 = sshll.u32 (!%p187_p10), %s704_s18, 8 }
  0x11   : > { %238 = vperm.xlu0 (!%p187_p10), %631, %v232_v1   ;;  %248 = vperm.xlu1 (!%p187_p10), %632, %v234_v3   ;;  %s549_s11 = sshll.u32 (!%p187_p10), %s213_s10, 4  ;;  %s836_s24 = scalar_lea.hbm (!%p187_p10), %s885_s4, %s565_s14 }
  0x12   : > { %s215_s12 = scalar_lea.vmem (!%p187_p10), [#allocation2], %s549_s11  ;;  %s452_s26 = scalar_lea.sflag (!%p187_p10), [#allocation3], %s213_s10 }
  0x13   : > { %s468_s13 = sshll.u32 (!%p187_p10), %s215_s12, 4  ;;  %s831_s13 = int_to_ptr.vmem [resolvable:$true] %s468_s13 }
  0x14   : > { %s634_s29 = scalar_lea.vmem (!%p187_p10), %s831_s13, 256 }
  0x15   : > { %243 = vperm.xlu0 (!%p187_p10), %631, %v233_v4   ;;  %253 = vperm.xlu1 (!%p187_p10), %632, %v235_v5   ;;  %p635_p12 = scmp.ne.s32.totalorder (!%p187_p10), %s831_s13, %s634_s29 }
  0x16   : > { %s218_s5 = scalar_select %p217_p11, %s704_s18, 1 }
  0x17   : > { %p636_p13 = pnand %p635_p12, %p782_p4  ;;  %s716_s18 = smov [#allocation2]  }
  0x18   : > { %s564_s8 = sshll.u32 %s218_s5, 3  ;;  %s638_s30 = sshll.u32 %s716_s18, 4  ;;  %s639_s30 = int_to_ptr.vmem [resolvable:$false] %s638_s30 }
  0x19   : > { %s224_s21 = scalar_lea.vmem %s881_s0, %s564_s8  ;;  %p637_p0 = pneg %p636_p13 }
  0x1a   : > { %v227_v6 = vld [vmem:[%s224_s21] sm:$0xff]  ;;  %s640_s5 = scalar_lea.vmem %s639_s30, 512  ;;  %p641_p1 = scmp.lt.s32.totalorder %s831_s13, %s639_s30 }
  0x1b   : > { %v257_v7 = vcombine.high %v227_v6, %v227_v6  ;;  %p642_p2 = scmp.lt.s32.totalorder %s640_s5, %s634_s29 }
  0x1d   : > { %552 = vmatprep.subr.msk.mxu0 %vm271_vm0, %v257_v7  ;;  %p643_p3 = por %p642_p2, %p641_p1 }
  0x1e   : > { %553 = vmatpush1.msk.msra.mxu0 %vm271_vm0, %v227_v6 }
  0x1f   : > { %554 = vmatmul.mubr.msk.f32.vlgmr.msra.gmra.mrb[0].mxu0 %vm258_vm1, %v228_v8  ;;  %p644_p5 = pnand %p643_p3, %p637_p0 }
  0x20   : > { %346 = vmatprep.mubr.f32.mxu0 %v714_v0 }
  0x23   : > { %555 = vmatmul.mubr.msk.f32.gmra.mrb[2].mxu0 %vm258_vm1, %v229_v9 }
  0x24   : > { %352 = vmatprep.mubr.f32.mxu0 %v714_v0 }
  0x27   : > { %556 = vmatmul.mubr.msk.f32.gmra.mrb[4].mxu0 %vm258_vm1, %v230_v10 }
  0x28   : > { %358 = vmatprep.mubr.f32.mxu0 %v714_v0 }
  0x2b   : > { %557 = vmatmul.mubr.msk.f32.gmra.mrb[6].mxu0 %vm258_vm1, %v231_v11 }
  0x90   : > { %v239_v12 = vpop.permute.xlu0 %238  ;;  %v249_v21 = vpop.permute.xlu1 %248 }
  0x94   : > { %v244_v15 = vpop.permute.xlu0 %243  ;;  %v254_v32 = vpop.permute.xlu1 %253 }
  0xf2   : > { %v342_v13 = vpop.f32.mrb[0].mxu0 }
  0xf3   : > { %v344_v14 = vpop.f32.mrb[1].mxu0  ;;  %v343_v16 = vadd.f32 %v342_v13, %v239_v12 }
  0xf4   : > { %v345_v17 = vadd.f32 %v344_v14, %v239_v12 }
  0xf5   : > { %v365_v23 = vmax.f32 %v343_v16, 0.0 }
  0xf6   : > { %v348_v18 = vpop.f32.mrb[2].mxu0  ;;  %v366_v25 = vmax.f32 %v345_v17, 0.0 }
  0xf7   : > { %v349_v19 = vadd.f32 %v348_v18, %v244_v15  ;;  %v350_v20 = vpop.f32.mrb[3].mxu0 }
  0xf8   : > { %v351_v22 = vadd.f32 %v350_v20, %v244_v15 }
  0xf9   : > { %v367_v24 = vmax.f32 %v349_v19, 0.0 }
  0xfa   : > { %v368_v26 = vmax.f32 %v351_v22, 0.0  ;;  %v354_v27 = vpop.f32.mrb[4].mxu0 }
  0xfb   : > { %v356_v28 = vpop.f32.mrb[5].mxu0  ;;  %v568_v29 = vpack.c.bf16 %v367_v24, %v365_v23  ;;  %v355_v31 = vadd.f32 %v354_v27, %v249_v21 }
  0xfc   : > { %v566_v30 = vpack.c.bf16 %v368_v26, %v366_v25  ;;  %v357_v33 = vadd.f32 %v356_v28, %v249_v21 }
  0xfd   : > { %v369_v38 = vmax.f32 %v355_v31, 0.0 }
  0xfe   : > { %v360_v34 = vpop.f32.mrb[6].mxu0  ;;  %567 = vmatprep.subr.bf16.mxu1 %v566_v30  ;;  %v370_v40 = vmax.f32 %v357_v33, 0.0 }
  0xff   : > { %v361_v35 = vadd.f32 %v360_v34, %v254_v32  ;;  %v362_v36 = vpop.f32.mrb[7].mxu0  ;;  %569 = vmatpush1.bf16.msra.mxu1 %v568_v29 }
 0x100   : > { %v363_v37 = vadd.f32 %v362_v36, %v254_v32 }
 0x101   : > { %v371_v39 = vmax.f32 %v361_v35, 0.0 }
 0x102   : > { %v372_v41 = vmax.f32 %v363_v37, 0.0 }
 0x103   : > { %v572_v42 = vpack.c.bf16 %v371_v39, %v369_v38 }
 0x104   : > { %v570_v43 = vpack.c.bf16 %v372_v41, %v370_v40 }
 0x106   : > { %571 = vmatprep.subr.bf16.mxu1 %v570_v43 }
 0x107   : > { %573 = vmatpush1.bf16.msra.mxu1 %v572_v42 }
 0x10a   : > { %558 = vmatmul.mubr.msk.f32.vlgmr.msra.gmra.mrb[0].mxu1 %vm374_vm2, %v373_v44 }
 0x1dd   : > { %v444_v45 = vpop.f32.mrb[0].mxu1 }
 0x1de   : > { %449 = vst [vmem:[%s215_s12] sm:$0xff] %v444_v45  ;;  %v446_v46 = vpop.f32.mrb[1].mxu1 }
 0x1df   : > { %450 = vst [vmem:[%s215_s12 + $0x8] sm:$0xff] %v446_v46 }
 0x1e0   : > { %647 = shalt.err (!%p644_p5)
}
 0x1e1   : > { %s648_s6 = scalar_lea.hbm %s836_s24, 256  ;;  %s652_s9 = scalar_lea.hbm %s885_s4, 512 }
 0x1e2   : > { %p649_p6 = scmp.ne.s32.totalorder %s836_s24, %s648_s6  ;;  %p653_p10 = scmp.lt.u32.totalorder %s836_s24, %s885_s4 }
 0x1e3   : > { %p654_p11 = scmp.lt.u32.totalorder %s652_s9, %s648_s6  ;;  %p656_p13 = scmp.lt.u32.totalorder %s648_s6, %s836_s24 }
 0x1e4   : > { %p650_p7 = pnand %p649_p6, %p782_p4 }
 0x1e5   : > { %p655_p12 = por %p654_p11, %p653_p10 }
 0x1e6   : > { %p651_p9 = pneg %p650_p7 }
 0x1e7   : > { %p657_p0 = por %p656_p13, %p655_p12 }
 0x1e9   : > { %p658_p1 = pnand %p657_p0, %p651_p9 }
 0x1eb   : > { %661 = shalt.err (!%p658_p1)
}
 0x1ec   : > { %574 = dma.vmem_to_hbm [thread:$0]  (%p782_p4), %s831_s13, 256, %s836_s24, %s452_s26  }
 0x1ed PF: > { %p580_p2 = scmp.ge.s32.totalorder %s712_s20, 2  ;;  %s480_s12 = sand.u32 1, %s692_s15  }
 0x1ee   : > { %s481_s14 = scalar_lea.sflag [#allocation3], %s480_s12 }
 0x1ef   : > { %p577_p3 = pnand %p580_p2, %p789_p8 }
 0x1f1   : > { %687 = dma.done.wait (!%p577_p3), %s481_s14, 256  }
 0x1f2   : > { %689 = vsyncadd (!%p577_p3), %s481_s14, 4294967040  ;;  %s17_s20 = sadd.s32 1, %s712_s20   ;;  %s888_s15 = smov %s696_s16 }
 0x1f3   : > { %p14_p5 = scmp.ge.s32.totalorder %s17_s20, 4   ;;  %s889_s16 = smov %s700_s17 }
 0x1f4   : > { %s890_s17 = smov %s795_s28  ;;  %s891_s18 = smov %s708_s19 }
 0x1f5   : > { %s892_s19 = smov %s894_s23  ;;  %16 = sbr.rel (!%p14_p5) target bundleno = 4 (0x4), region = 71 }
 0x1fc   :  { %486 = vsyncpa [#allocation3], 1 }
 0x1fd   :  { %488 = vsyncpa [#allocation3 + $0x1], 1 }

</bundles_post_ra>
